<compile_context>
chip_gen: v5e
topology: v5e:2x2
jax: 0.10.0
libtpu: 0.0.40
codegen_flags: <defaults>
</compile_context>

<pallas_src>
import functools

import jax
import jax.numpy as jnp
from jax.experimental import pallas as pl
from jax.experimental.pallas import tpu as pltpu


def encoder_kernel(x_ref, wf_ref, bf_ref, w2_ref, b2_ref, out_ref, *,
                   latent, hid):
    x = x_ref[...]                                            # (tb, H)

    # One fused projection on the MXU: (tb, H) @ (H, HID + 128).
    y = (jnp.dot(x, wf_ref[...], preferred_element_type=jnp.float32)
         + bf_ref[...])                                       # (tb, HID+128)

    # obj head: ReLU on the lane-aligned [0:HID) slice, then a VPU multiply
    # + lane reduction instead of an N=1 MXU matmul.  Scalar bias from SMEM.
    h = jnp.maximum(y[:, :hid], 0.0)                          # (tb, HID)
    logits = (jnp.sum(h * w2_ref[...], axis=-1, keepdims=True)
              + b2_ref[0])                                    # (tb, 1)
    obj = jax.nn.sigmoid(logits)                              # EUP exp path

    # Lane-dense packed output: [0:L) means | [L:2L) log_vars | [2L] obj | 0s.
    out_slab = y[:, hid:hid + out_ref.shape[-1]]              # (tb, 128)
    lane = jax.lax.broadcasted_iota(jnp.int32, out_slab.shape, 1)
    out_ref[...] = jnp.where(lane == 2 * latent, obj, out_slab)


@functools.partial(jax.jit, static_argnames=("tb",))
def encoder_forward(x, params, tb=128):
    """Encoder forward pass. Returns (means, log_vars, obj, x)."""
    B, H = x.shape
    wm, bm, wlv, blv, w1, b1, w2, b2 = params
    L = wm.shape[1]
    HID = w1.shape[1]                      # 128 in the reference module

    OUT_P = 128                            # packed output lane width
    assert 2 * L + 1 <= OUT_P, "latent too large for packed output slab"
    P = HID + OUT_P                        # fused projection width

    # Fused [obj.L0 | means | log_var | zero-pad] weight & bias, [in, out].
    zpad_w = jnp.zeros((H, P - HID - 2 * L), jnp.float32)
    zpad_b = jnp.zeros((1, P - HID - 2 * L), jnp.float32)
    w_fused = jnp.concatenate([w1, wm, wlv, zpad_w], axis=1)   # (H, P)
    b_fused = jnp.concatenate([b1, bm, blv, zpad_b], axis=1)   # (1, P)
    w2_row = w2.reshape(1, HID)                                # (1, HID)
    b2_s = b2.reshape(-1)                                      # (1,) -> SMEM

    # Pad batch to a multiple of tb so no tail rows are silently dropped.
    B_pad = pl.cdiv(B, tb) * tb
    x_p = x if B_pad == B else jnp.pad(x, ((0, B_pad - B), (0, 0)))
    grid = (B_pad // tb,)

    const = lambda shape: pl.BlockSpec(shape, lambda i: (0, 0))

    packed = pl.pallas_call(
        functools.partial(encoder_kernel, latent=L, hid=HID),
        out_shape=jax.ShapeDtypeStruct((B_pad, OUT_P), jnp.float32),
        grid_spec=pltpu.PrefetchScalarGridSpec(
            num_scalar_prefetch=0,
            grid=grid,
            in_specs=[
                pl.BlockSpec((tb, H), lambda i: (i, 0)),       # x tile
                const((H, P)),                                 # fused weight
                const((1, P)),                                 # fused bias
                const((1, HID)),                               # W2 as a row
                pl.BlockSpec(memory_space=pltpu.MemorySpace.SMEM),  # b2
            ],
            out_specs=pl.BlockSpec((tb, OUT_P), lambda i: (i, 0)),
        ),
        compiler_params=pltpu.CompilerParams(
            dimension_semantics=("parallel",)),
    )(x_p, w_fused, b_fused, w2_row, b2_s)

    means = packed[:B, :L]
    log_vars = packed[:B, L:2 * L]
    obj = packed[:B, 2 * L:2 * L + 1]
    return means, log_vars, obj, x


def init_linear(key, fan_in, fan_out):
    """PyTorch-style nn.Linear init, stored as [in, out] + [1, out]."""
    kw, kb = jax.random.split(key)
    bound = 1.0 / jnp.sqrt(fan_in)
    w = jax.random.uniform(kw, (fan_in, fan_out), jnp.float32, -bound, bound)
    b = jax.random.uniform(kb, (1, fan_out), jnp.float32, -bound, bound)
    return w, b


def reference_forward(x, params):
    wm, bm, wlv, blv, w1, b1, w2, b2 = params
    means = x @ wm + bm
    log_vars = x @ wlv + blv
    h = jnp.maximum(x @ w1 + b1, 0.0)
    obj = jax.nn.sigmoid(h @ w2 + b2)
    return means, log_vars, obj, x


if __name__ == "__main__":
    # Module config: layer_sizes[-1] = 32 features in, latent_size = 16,
    # obj hidden = 128, conditional=False.  B is NOT a multiple of the batch
    # tile to exercise the padded-tail path (2 grid steps at tb=128).
    B, H, L, HID = 200, 32, 16, 128

    key = jax.random.PRNGKey(0)
    kx, k1, k2, k3, k4 = jax.random.split(key, 5)

    x = jax.random.normal(kx, (B, H), jnp.float32)

    wm, bm = init_linear(k1, H, L)      # linear_means
    wlv, blv = init_linear(k2, H, L)    # linear_log_var
    w1, b1 = init_linear(k3, H, HID)    # obj.L0
    w2, b2 = init_linear(k4, HID, 1)    # linear_obj
    params = (wm, bm, wlv, blv, w1, b1, w2, b2)

    # NOTE: on v6e/v7x with large batches, pass tb=256 for full MXU M-tiles.
    means, log_vars, obj, x_out = encoder_forward(x, params, tb=128)
    jax.block_until_ready((means, log_vars, obj, x_out))

    # Sanity check against pure-JAX reference.
    r_means, r_log_vars, r_obj, _ = reference_forward(x, params)
    assert means.shape == (B, L) and log_vars.shape == (B, L)
    assert obj.shape == (B, 1)
    assert jnp.allclose(means, r_means, atol=1e-4, rtol=1e-4)
    assert jnp.allclose(log_vars, r_log_vars, atol=1e-4, rtol=1e-4)
    assert jnp.allclose(obj, r_obj, atol=1e-4, rtol=1e-4)
    assert jnp.array_equal(x_out, x)

    print("KERNEL_OK")
</pallas_src>

<mosaic_0001>
module attributes {stable_mosaic.version = 11 : i64} {
  func.func @encoder_kernel(%arg0: i32, %arg1: memref<128x32xf32, #tpu.memory_space<vmem>>, %arg2: memref<32x256xf32, #tpu.memory_space<vmem>>, %arg3: memref<1x256xf32, #tpu.memory_space<vmem>>, %arg4: memref<1x128xf32, #tpu.memory_space<vmem>>, %arg5: memref<1xf32, #tpu.memory_space<smem>>, %arg6: memref<128x128xf32, #tpu.memory_space<vmem>>) attributes {dimension_semantics = [#tpu.dimension_semantics<parallel>], iteration_bounds = array<i64: 2>, scalar_prefetch = 0 : i64, scratch_operands = 0 : i64, tpu.core_type = #tpu.core_type<tc>, window_params = [{transform_indices = @transform_0, window_bounds = array<i64: 128, 32>}, {pipeline_mode = #tpu.pipeline_mode<synchronous>, transform_indices = @transform_1, window_bounds = array<i64: 32, 256>}, {pipeline_mode = #tpu.pipeline_mode<synchronous>, transform_indices = @transform_2, window_bounds = array<i64: 1, 256>}, {pipeline_mode = #tpu.pipeline_mode<synchronous>, transform_indices = @transform_3, window_bounds = array<i64: 1, 128>}, {transform_indices = @transform_4, window_bounds = array<i64: 1>}, {transform_indices = @transform_5, window_bounds = array<i64: 128, 128>}]} {
    %c0 = arith.constant 0 : index
    %c0_0 = arith.constant 0 : index
    %0 = vector.load %arg1[%c0, %c0_0] : memref<128x32xf32, #tpu.memory_space<vmem>>, vector<128x32xf32>
    %c0_1 = arith.constant 0 : index
    %c0_2 = arith.constant 0 : index
    %1 = vector.load %arg2[%c0_1, %c0_2] : memref<32x256xf32, #tpu.memory_space<vmem>>, vector<32x256xf32>
    %cst = arith.constant dense<0.000000e+00> : vector<128x256xf32>
    %2 = tpu.matmul %0, %1, %cst {dimension_numbers = #tpu.dot_dimension_numbers<[1], [0], [0], [1], [0, 0, 1, 1], [], []>} : vector<128x32xf32>, vector<32x256xf32>, vector<128x256xf32> -> vector<128x256xf32>
    %c0_3 = arith.constant 0 : index
    %c0_4 = arith.constant 0 : index
    %3 = vector.load %arg3[%c0_3, %c0_4] : memref<1x256xf32, #tpu.memory_space<vmem>>, vector<1x256xf32>
    %4 = vector.broadcast %3 : vector<1x256xf32> to vector<128x256xf32>
    %5 = arith.addf %2, %4 : vector<128x256xf32>
    %6 = vector.extract_strided_slice %5 {offsets = [0, 0], sizes = [128, 128], strides = [1, 1]} : vector<128x256xf32> to vector<128x128xf32>
    %cst_5 = arith.constant 0.000000e+00 : f32
    %7 = vector.broadcast %cst_5 : f32 to vector<128x128xf32>
    %8 = arith.maximumf %6, %7 : vector<128x128xf32>
    %c0_6 = arith.constant 0 : index
    %c0_7 = arith.constant 0 : index
    %9 = vector.load %arg4[%c0_6, %c0_7] : memref<1x128xf32, #tpu.memory_space<vmem>>, vector<1x128xf32>
    %10 = vector.broadcast %9 : vector<1x128xf32> to vector<128x128xf32>
    %11 = arith.mulf %8, %10 : vector<128x128xf32>
    %cst_8 = arith.constant dense<0.000000e+00> : vector<128xf32>
    %12 = vector.multi_reduction <add>, %11, %cst_8 [1] : vector<128x128xf32> to vector<128xf32>
    %13 = vector.shape_cast %12 : vector<128xf32> to vector<128x1xf32>
    %c0_9 = arith.constant 0 : index
    %14 = memref.load %arg5[%c0_9] : memref<1xf32, #tpu.memory_space<smem>>
    %15 = vector.broadcast %14 : f32 to vector<128x1xf32>
    %16 = arith.addf %13, %15 : vector<128x1xf32>
    %17 = arith.negf %16 : vector<128x1xf32>
    %18 = math.exp %17 : vector<128x1xf32>
    %cst_10 = arith.constant 1.000000e+00 : f32
    %19 = vector.broadcast %cst_10 : f32 to vector<128x1xf32>
    %20 = arith.addf %19, %18 : vector<128x1xf32>
    %21 = arith.divf %19, %20 : vector<128x1xf32>
    %22 = vector.extract_strided_slice %5 {offsets = [0, 128], sizes = [128, 128], strides = [1, 1]} : vector<128x256xf32> to vector<128x128xf32>
    %23 = tpu.iota {dimensions = array<i32: 1>} : vector<128x128xi32>
    %c32_i32 = arith.constant 32 : i32
    %24 = vector.broadcast %c32_i32 : i32 to vector<128x128xi32>
    %25 = arith.cmpi eq, %23, %24 : vector<128x128xi32>
    %26 = vector.shape_cast %21 : vector<128x1xf32> to vector<128x1xf32>
    %27 = vector.broadcast %26 : vector<128x1xf32> to vector<128x128xf32>
    %28 = arith.select %25, %27, %22 : vector<128x128xi1>, vector<128x128xf32>
    %c0_11 = arith.constant 0 : index
    %c0_12 = arith.constant 0 : index
    %29 = vector.load %arg6[%c0_11, %c0_12] : memref<128x128xf32, #tpu.memory_space<vmem>>, vector<128x128xf32>
    tpu.vector_store %arg6[%c0_11, %c0_12], %28 {strides = array<i32>} : memref<128x128xf32, #tpu.memory_space<vmem>>, vector<128x128xf32>,
    return
  }
  func.func @transform_0(%arg0: i32) -> (i32, i32) {
    %c0_i32 = arith.constant 0 : i32
    %c0_i32_0 = arith.constant 0 : i32
    return %arg0, %c0_i32 : i32, i32
  }
  func.func @transform_1(%arg0: i32) -> (i32, i32) {
    %c0_i32 = arith.constant 0 : i32
    %c0_i32_0 = arith.constant 0 : i32
    %c0_i32_1 = arith.constant 0 : i32
    return %c0_i32, %c0_i32_0 : i32, i32
  }
  func.func @transform_2(%arg0: i32) -> (i32, i32) {
    %c0_i32 = arith.constant 0 : i32
    %c0_i32_0 = arith.constant 0 : i32
    %c0_i32_1 = arith.constant 0 : i32
    return %c0_i32, %c0_i32_0 : i32, i32
  }
  func.func @transform_3(%arg0: i32) -> (i32, i32) {
    %c0_i32 = arith.constant 0 : i32
    %c0_i32_0 = arith.constant 0 : i32
    %c0_i32_1 = arith.constant 0 : i32
    return %c0_i32, %c0_i32_0 : i32, i32
  }
  func.func @transform_4(%arg0: i32) -> i32 {
    %c0_i32 = arith.constant 0 : i32
    %c0_i32_0 = arith.constant 0 : i32
    return %c0_i32 : i32
  }
  func.func @transform_5(%arg0: i32) -> (i32, i32) {
    %c0_i32 = arith.constant 0 : i32
    %c0_i32_0 = arith.constant 0 : i32
    return %arg0, %c0_i32 : i32, i32
  }
}

</mosaic_0001>

<bundles_post_ra>
// kernel: encoder_forward.1
= control target key start
LH: loop header
LB: loop body
LE: loop exit
PB: predicated region body
PF: predicated region fallthrough
CT: control target
= control target key end

     0   :  { %s1100_s20 = smov 0   ;;  %s1610_s0 = inlined_call_operand.vmem [shape: f32[256,32], index: 0, kind: input, shape index: {}]   ;;  %s1611_s1 = inlined_call_operand.vmem [shape: f32[32,256], index: 1, kind: input, shape index: {}]   ;;  %s1612_s2 = inlined_call_operand.vmem [shape: f32[1,256], index: 2, kind: input, shape index: {}]   ;;  %s1613_s3 = inlined_call_operand.vmem [shape: f32[1,128], index: 3, kind: input, shape index: {}]   ;;  %s1614_s4 = inlined_call_operand.<no memory space> [shape: f32[1], index: 4, kind: input, shape index: {}]   ;;  %s1615_s5 = inlined_call_operand.vmem [shape: f32[256,128], index: 5, kind: output, shape index: {}]  }
   0x1   :  { %10 = sst [smem:[#allocation2]] %s1614_s4 }
   0x2 LB: > { %s919_s21 = sadd.s32 4294967295, %s1065_s20   ;;  %p923_p0 = scmp.ge.s32.totalorder %s1065_s20, 1  ;;  %s1065_s20 = sphi %s1100_s20, %s16_s20  }
   0x3   : > { %p189_p1 = scmp.lt.s32.totalorder %s1065_s20, 3 }
   0x5   : > { %p190_p2 = pnand %p923_p0, %p189_p1 }
   0x6   : > { %s924_s25 = sshll.u32 (!%p190_p2), %s919_s21, 4  ;;  %s506_s22 = sld [smem:[#allocation2]] (!%p190_p2) }
   0x7   : > { %193 = sbr.rel (%p190_p2) target bundleno = 366 (0x16e), region = 40  ;;  %p218_p3 = scmp.lt.s32.totalorder (!%p190_p2), %s924_s25, 31 }
   0xc   : > { %v251_v0 = vld [vmem:[%s1611_s1 + $0x30] sm:$0xff]  ;;  %v249_v1 = vld [vmem:[%s1611_s1 + $0x20] sm:$0xff]  ;;  %s1641_s25 = smov (!%p218_p3, %s924_s25), 31  ;;  %vm259_vm0 = vcmask 261120   ;;  %v252_v20 = vld [vmem:[%s1611_s1 + $0x38] sm:$0xff] }
   0xd   : > { %320 = vmatpush.msra.mxu0 %v251_v0  ;;  %978 = vmatpush.msra.mxu2 %v251_v0  ;;  %v247_v2 = vld [vmem:[%s1611_s1 + $0x10] sm:$0xff]  ;;  %v245_v3 = vld [vmem:[%s1611_s1] sm:$0xff]  ;;  %s925_s30 = sshll.u32 %s1641_s25, 3  ;;  %v250_v21 = vld [vmem:[%s1611_s1 + $0x28] sm:$0xff] }
   0xe   : > { %s1128_s8 = scalar_lea.vmem %s1610_s0, %s925_s30  ;;  %385 = vmatpush.msra.mxu1 %v252_v20  ;;  %982 = vmatpush.msra.mxu3 %v252_v20  ;;  %v248_v22 = vld [vmem:[%s1611_s1 + $0x18] sm:$0xff]  ;;  %v246_v23 = vld [vmem:[%s1611_s1 + $0x8] sm:$0xff]  ;;  %v1203_v24 = vld [vmem:[%s1612_s2] sm:$0x3]  ;;  %s1321_s24 = scalar_lea.vmem %s1615_s5, %s925_s30 }
   0xf   : > { %321 = vmatpush.msra.mxu0 %v249_v1  ;;  %979 = vmatpush.msra.mxu2 %v249_v1  ;;  %v229_v4 = vld [vmem:[%s1128_s8] sm:$0xff]  ;;  %v230_v6 = vld [vmem:[%s1128_s8 + $0x8] sm:$0xff]  ;;  %v231_v8 = vld [vmem:[%s1128_s8 + $0x10] sm:$0xff]  ;;  %v1206_v25 = vperm.slane %v1203_v24, 0 }
  0x10   : > { %v237_v5 = vld [vmem:[%s1128_s8 + $0x40] sm:$0xff]  ;;  %v238_v7 = vld [vmem:[%s1128_s8 + $0x48] sm:$0xff]  ;;  %v239_v9 = vld [vmem:[%s1128_s8 + $0x50] sm:$0xff]  ;;  %386 = vmatpush.msra.mxu1 %v250_v21  ;;  %983 = vmatpush.msra.mxu3 %v250_v21 }
  0x11   : > { %322 = vmatpush.msra.mxu0 %v247_v2  ;;  %980 = vmatpush.msra.mxu2 %v247_v2  ;;  %v232_v10 = vld [vmem:[%s1128_s8 + $0x18] sm:$0xff]  ;;  %v1147_v12 = vld [vmem:[%s1128_s8 + $0x20] sm:$0xff]  ;;  %v1157_v14 = vld [vmem:[%s1128_s8 + $0x28] sm:$0xff] }
  0x12   : > { %v240_v11 = vld [vmem:[%s1128_s8 + $0x58] sm:$0xff]  ;;  %v1150_v13 = vld [vmem:[%s1128_s8 + $0x60] sm:$0xff]  ;;  %v1160_v15 = vld [vmem:[%s1128_s8 + $0x68] sm:$0xff]  ;;  %387 = vmatpush.msra.mxu1 %v248_v22  ;;  %984 = vmatpush.msra.mxu3 %v248_v22 }
  0x13   : > { %323 = vmatpush.msra.mxu0 %v245_v3  ;;  %981 = vmatpush.msra.mxu2 %v245_v3  ;;  %v1167_v16 = vld [vmem:[%s1128_s8 + $0x30] sm:$0xff]  ;;  %v1177_v18 = vld [vmem:[%s1128_s8 + $0x38] sm:$0xff]  ;;  %v1212_v28 = vld [vmem:[%s1613_s3] ss:$0 sm:$0xff] }
  0x14   : > { %928 = vmatmul.msk.f32.vlgmr.msra.gmra.mxu0 %vm259_vm0, %v229_v4  ;;  %936 = vmatmul.msk.f32.vlgmr.msra.gmra.mxu2 %vm259_vm0, %v237_v5  ;;  %v1170_v17 = vld [vmem:[%s1128_s8 + $0x70] sm:$0xff]  ;;  %v1180_v19 = vld [vmem:[%s1128_s8 + $0x78] sm:$0xff] }
  0x15   : > { %388 = vmatpush.msra.mxu1 %v246_v23  ;;  %985 = vmatpush.msra.mxu3 %v246_v23 }
  0x16   : > { %944 = vmatmul.msk.f32.vlgmr.msra.gmra.mxu1 %vm259_vm0, %v229_v4  ;;  %952 = vmatmul.msk.f32.vlgmr.msra.gmra.mxu3 %vm259_vm0, %v237_v5 }
  0x1c   : > { %929 = vmatmul.msk.f32.gmra.mxu0 %vm259_vm0, %v230_v6  ;;  %937 = vmatmul.msk.f32.gmra.mxu2 %vm259_vm0, %v238_v7 }
  0x1e   : > { %945 = vmatmul.msk.f32.gmra.mxu1 %vm259_vm0, %v230_v6  ;;  %953 = vmatmul.msk.f32.gmra.mxu3 %vm259_vm0, %v238_v7 }
  0x24   : > { %930 = vmatmul.msk.f32.gmra.mxu0 %vm259_vm0, %v231_v8  ;;  %938 = vmatmul.msk.f32.gmra.mxu2 %vm259_vm0, %v239_v9 }
  0x26   : > { %946 = vmatmul.msk.f32.gmra.mxu1 %vm259_vm0, %v231_v8  ;;  %954 = vmatmul.msk.f32.gmra.mxu3 %vm259_vm0, %v239_v9 }
  0x2c   : > { %931 = vmatmul.msk.f32.gmra.mxu0 %vm259_vm0, %v232_v10  ;;  %939 = vmatmul.msk.f32.gmra.mxu2 %vm259_vm0, %v240_v11 }
  0x2e   : > { %947 = vmatmul.msk.f32.gmra.mxu1 %vm259_vm0, %v232_v10  ;;  %955 = vmatmul.msk.f32.gmra.mxu3 %vm259_vm0, %v240_v11 }
  0x34   : > { %932 = vmatmul.msk.f32.gmra.mxu0 %vm259_vm0, %v1147_v12  ;;  %940 = vmatmul.msk.f32.gmra.mxu2 %vm259_vm0, %v1150_v13 }
  0x36   : > { %948 = vmatmul.msk.f32.gmra.mxu1 %vm259_vm0, %v1147_v12  ;;  %956 = vmatmul.msk.f32.gmra.mxu3 %vm259_vm0, %v1150_v13 }
  0x3c   : > { %933 = vmatmul.msk.f32.gmra.mxu0 %vm259_vm0, %v1157_v14  ;;  %941 = vmatmul.msk.f32.gmra.mxu2 %vm259_vm0, %v1160_v15 }
  0x3e   : > { %949 = vmatmul.msk.f32.gmra.mxu1 %vm259_vm0, %v1157_v14  ;;  %957 = vmatmul.msk.f32.gmra.mxu3 %vm259_vm0, %v1160_v15 }
  0x44   : > { %934 = vmatmul.msk.f32.gmra.mxu0 %vm259_vm0, %v1167_v16  ;;  %942 = vmatmul.msk.f32.gmra.mxu2 %vm259_vm0, %v1170_v17 }
  0x46   : > { %950 = vmatmul.msk.f32.gmra.mxu1 %vm259_vm0, %v1167_v16  ;;  %958 = vmatmul.msk.f32.gmra.mxu3 %vm259_vm0, %v1170_v17 }
  0x4c   : > { %935 = vmatmul.msk.f32.gmra.mxu0 %vm259_vm0, %v1177_v18  ;;  %943 = vmatmul.msk.f32.gmra.mxu2 %vm259_vm0, %v1180_v19 }
  0x4e   : > { %951 = vmatmul.msk.f32.gmra.mxu1 %vm259_vm0, %v1177_v18  ;;  %959 = vmatmul.msk.f32.gmra.mxu3 %vm259_vm0, %v1180_v19 }
  0x91   : > { %v325_v26 = vpop.f32.mrf.mxu0 }
  0x92   : > { %v326_v27 = vadd.f32 %v325_v26, %v1206_v25 }
  0x94   : > { %v438_v29 = vmax.f32 %v326_v27, 0.0 }
  0x96   : > { %v458_v30 = vmul.f32 %v1212_v28, %v438_v29 }
  0x97   : > { %v349_v31 = vpop.f32.mrf.mxu2 }
  0x98   : > { %v350_v32 = vadd.f32 %v349_v31, %v1206_v25  ;;  %474 = vadd.xlane.f32.xlu0 %v458_v30  ;;  %v1267_v30 = vstv %s506_s22 }
  0x99   : > { %v328_v33 = vpop.f32.mrf.mxu0 }
  0x9a   : > { %v446_v34 = vmax.f32 %v350_v32, 0.0  ;;  %v329_v35 = vadd.f32 %v328_v33, %v1206_v25 }
  0x9c   : > { %v439_v36 = vmax.f32 %v329_v35, 0.0  ;;  %v466_v37 = vmul.f32 %v1212_v28, %v446_v34  ;;  %v390_v34 = vpop.f32.mrf.mxu1 }
  0x9e   : > { %490 = vadd.xlane.f32.xlu2 %v466_v37  ;;  %v459_v38 = vmul.f32 %v1212_v28, %v439_v36 }
  0x9f   : > { %v352_v39 = vpop.f32.mrf.mxu2 }
  0xa0   : > { %v353_v40 = vadd.f32 %v352_v39, %v1206_v25  ;;  %476 = vadd.xlane.f32.xlu0 %v459_v38 }
  0xa1   : > { %v331_v41 = vpop.f32.mrf.mxu0 }
  0xa2   : > { %v447_v42 = vmax.f32 %v353_v40, 0.0  ;;  %v332_v43 = vadd.f32 %v331_v41, %v1206_v25 }
  0xa4   : > { %v440_v44 = vmax.f32 %v332_v43, 0.0  ;;  %v467_v45 = vmul.f32 %v1212_v28, %v447_v42  ;;  %v393_v41 = vpop.f32.mrf.mxu1  ;;  %v414_v42 = vpop.f32.mrf.mxu3 }
  0xa6   : > { %v460_v46 = vmul.f32 %v1212_v28, %v440_v44 }
  0xa7   : > { %v355_v47 = vpop.f32.mrf.mxu2 }
  0xa8   : > { %v356_v48 = vadd.f32 %v355_v47, %v1206_v25  ;;  %478 = vadd.xlane.f32.xlu1 %v460_v46  ;;  %492 = vadd.xlane.f32.xlu0 %v467_v45  ;;  %v828_v45 = vlaneseq }
  0xa9   : > { %v334_v49 = vpop.f32.mrf.mxu0 }
  0xaa   : > { %v448_v50 = vmax.f32 %v356_v48, 0.0  ;;  %v335_v52 = vadd.f32 %v334_v49, %v1206_v25 }
  0xac   : > { %v468_v51 = vmul.f32 %v1212_v28, %v448_v50  ;;  %v441_v56 = vmax.f32 %v335_v52, 0.0 }
  0xae   : > { %v461_v60 = vmul.f32 %v1212_v28, %v441_v56  ;;  %v1282_v56 = vand.u32 127, %v828_v45 }
  0xaf   : > { %v358_v53 = vpop.f32.mrf.mxu2 }
  0xb0   : > { %v359_v54 = vadd.f32 %v358_v53, %v1206_v25  ;;  %494 = vadd.xlane.f32.xlu1 %v468_v51  ;;  %v1277_v53 = vperm.slane %v1203_v24, 1  ;;  %vm830_vm1 = vcmp.eq.s32.totalorder %v1282_v56, 32 }
  0xb1   : > { %v337_v55 = vpop.f32.mrf.mxu0 }
  0xb2   : > { %v449_v57 = vmax.f32 %v359_v54, 0.0  ;;  %v338_v58 = vadd.f32 %v337_v55, %v1206_v25 }
  0xb4   : > { %v469_v59 = vmul.f32 %v1212_v28, %v449_v57  ;;  %v442_v62 = vmax.f32 %v338_v58, 0.0 }
  0xb6   : > { %496 = vadd.xlane.f32.xlu2 %v469_v59  ;;  %v462_v3 = vmul.f32 %v1212_v28, %v442_v62  ;;  %v396_v62 = vpop.f32.mrf.mxu1 }
  0xb7   : > { %v361_v61 = vpop.f32.mrf.mxu2 }
  0xb8   : > { %v362_v63 = vadd.f32 %v361_v61, %v1206_v25  ;;  %480 = vadd.xlane.f32.xlu1 %v461_v60  ;;  %v391_v61 = vadd.f32 %v390_v34, %v1277_v53 }
  0xb9   : > { %v340_v0 = vpop.f32.mrf.mxu0 }
  0xba   : > { %v450_v1 = vmax.f32 %v362_v63, 0.0  ;;  %v341_v2 = vadd.f32 %v340_v0, %v1206_v25  ;;  %v1288_v63 = vadd.f32 %v414_v42, %v1277_v53 }
  0xbc   : > { %v470_v4 = vmul.f32 %v1212_v28, %v450_v1  ;;  %v443_v6 = vmax.f32 %v341_v2, 0.0  ;;  %v1292_v1 = vadd.f32 %v393_v41, %v1277_v53 }
  0xbe   : > { %482 = vadd.xlane.f32.xlu2 %v462_v3  ;;  %498 = vadd.xlane.f32.xlu0 %v470_v4  ;;  %v463_v12 = vmul.f32 %v1212_v28, %v443_v6  ;;  %v417_v4 = vpop.f32.mrf.mxu3  ;;  %v399_v6 = vpop.f32.mrf.mxu1 }
  0xbf   : > { %v364_v5 = vpop.f32.mrf.mxu2 }
  0xc0   : > { %v365_v7 = vadd.f32 %v364_v5, %v1206_v25 }
  0xc1   : > { %v343_v8 = vpop.f32.mrf.mxu0 }
  0xc2   : > { %v451_v9 = vmax.f32 %v365_v7, 0.0  ;;  %v344_v10 = vadd.f32 %v343_v8, %v1206_v25  ;;  %v1300_v8 = vadd.f32 %v417_v4, %v1277_v53 }
  0xc4   : > { %v444_v11 = vmax.f32 %v344_v10, 0.0  ;;  %v471_v13 = vmul.f32 %v1212_v28, %v451_v9  ;;  %v1303_v9 = vadd.f32 %v396_v62, %v1277_v53 }
  0xc6   : > { %484 = vadd.xlane.f32.xlu2 %v463_v12  ;;  %v464_v14 = vmul.f32 %v1212_v28, %v444_v11 }
  0xc7   : > { %v367_v15 = vpop.f32.mrf.mxu2 }
  0xc8   : > { %v368_v16 = vadd.f32 %v367_v15, %v1206_v25  ;;  %486 = vadd.xlane.f32.xlu0 %v464_v14 }
  0xc9   : > { %v346_v17 = vpop.f32.mrf.mxu0 }
  0xca   : > { %v452_v20 = vmax.f32 %v368_v16, 0.0  ;;  %v347_v21 = vadd.f32 %v346_v17, %v1206_v25 }
  0xcc   : > { %v445_v18 = vmax.f32 %v347_v21, 0.0  ;;  %v472_v22 = vmul.f32 %v1212_v28, %v452_v20 }
  0xce   : > { %502 = vadd.xlane.f32.xlu2 %v472_v22  ;;  %v465_v19 = vmul.f32 %v1212_v28, %v445_v18 }
  0xcf   : > { %v370_v23 = vpop.f32.mrf.mxu2 }
  0xd0   : > { %v371_v26 = vadd.f32 %v370_v23, %v1206_v25  ;;  %488 = vadd.xlane.f32.xlu1 %v465_v19 }
  0xd2   : > { %v453_v27 = vmax.f32 %v371_v26, 0.0 }
  0xd4   : > { %v473_v29 = vmul.f32 %v1212_v28, %v453_v27 }
  0xd6   : > { %504 = vadd.xlane.f32.xlu0 %v473_v29 }
  0xd8   : > { %500 = vadd.xlane.f32.xlu1 %v471_v13 }
 0x10b   : > { %v475_v31 = vpop.xlane.xlu0 %474 }
 0x10c   : > { %v508_v32 = vadd.f32 %v1267_v30, %v475_v31 }
 0x10e   : > { %v960_v33 = vmul.f32 -1.442695, %v508_v32 }
 0x110   : > { %995 = vpow2.f32 %v960_v33 }
 0x111   : > { %v491_v35 = vpop.xlane.xlu2 %490 }
 0x112   : > { %v516_v36 = vadd.f32 %v1267_v30, %v491_v35 }
 0x113   : > { %v477_v37 = vpop.xlane.xlu0 %476 }
 0x114   : > { %v968_v25 = vmul.f32 -1.442695, %v516_v36  ;;  %v509_v38 = vadd.f32 %v1267_v30, %v477_v37 }
 0x116   : > { %v996_v39 = vpop.eup %995  ;;  %997 = vpow2.f32 %v968_v25  ;;  %v961_v28 = vmul.f32 -1.442695, %v509_v38 }
 0x117   : > { %v572_v40 = vadd.f32 1.0, %v996_v39 }
 0x118   : > { %999 = vpow2.f32 %v961_v28 }
 0x119   : > { %1001 = vrcp.f32 %v572_v40  ;;  %v597_v58 = vand.u32 2147483647, %v572_v40  ;;  %v599_v59 = vand.u32 2147483648, %v572_v40  ;;  %vm593_vm2 = vweird.f32 %v572_v40 }
 0x11b   : > { %v479_v43 = vpop.xlane.xlu1 %478  ;;  %v493_v44 = vpop.xlane.xlu0 %492  ;;  %vm1295_vm4 = vcmp.eq.f32.partialorder %v597_v58, 8.507059e+37  ;;  %v600_v7 = vor.u32 1.1754944e-38, %v599_v59 }
 0x11c   : > { %v998_v46 = vpop.eup %997  ;;  %v510_v47 = vadd.f32 %v1267_v30, %v479_v43  ;;  %v517_v48 = vadd.f32 %v1267_v30, %v493_v44 }
 0x11d   : > { %v1274_v49 = vadd.f32 1.0, %v998_v46  ;;  %v420_v46 = vpop.f32.mrf.mxu3 }
 0x11e   : > { %v1000_v50 = vpop.eup %999  ;;  %v962_v51 = vmul.f32 -1.442695, %v510_v47  ;;  %v969_v52 = vmul.f32 -1.442695, %v517_v48 }
 0x11f   : > { %v1002_v54 = vpop.eup %1001  ;;  %1003 = vrcp.f32 %v1274_v49  ;;  %v1280_v55 = vadd.f32 1.0, %v1000_v50  ;;  %v717_v0 = vand.u32 2147483647, %v1274_v49  ;;  %vm713_vm5 = vweird.f32 %v1274_v49 }
 0x120   : > { %v589_v57 = vmul.f32 %v1002_v54, %v572_v40  ;;  %1005 = vpow2.f32 %v962_v51  ;;  %vm594_vm3 = vweird.f32 %v1002_v54  ;;  %v719_v17 = vand.u32 2147483648, %v1274_v49 }
 0x121   : > { %1007 = vrcp.f32 %v1280_v55  ;;  %vm595_vm6 = vmor %vm593_vm2, %vm594_vm3  ;;  %vm1310_vm7 = vcmp.eq.f32.partialorder %v717_v0, 8.507059e+37  ;;  %v612_v20 = vand.u32 2147483647, %v1280_v55  ;;  %vm608_vm9 = vweird.f32 %v1280_v55 }
 0x122   : > { %v590_v60 = vsub.f32 1.0, %v589_v57  ;;  %1009 = vpow2.f32 %v969_v52  ;;  %v614_v35 = vand.u32 2147483648, %v1280_v55  ;;  %v720_v39 = vor.u32 1.1754944e-38, %v719_v17 }
 0x123   : > { %v495_v24 = vpop.xlane.xlu1 %494  ;;  %vm1340_vm12 = vcmp.eq.f32.partialorder %v612_v20, 8.507059e+37  ;;  %v1354_v51 = vadd.f32 %v420_v46, %v1277_v53 }
 0x124   : > { %v518_v2 = vadd.f32 %v1267_v30, %v495_v24  ;;  %v591_v3 = vmul.f32 %v1002_v54, %v590_v60  ;;  %v615_v50 = vor.u32 1.1754944e-38, %v614_v35  ;;  %v1405_v35 = vadd.f32 %v399_v6, %v1277_v53 }
 0x125   : > { %v1004_v5 = vpop.eup %1003 }
 0x126   : > { %v1006_v10 = vpop.eup %1005  ;;  %v709_v11 = vmul.f32 %v1004_v5, %v1274_v49  ;;  %v970_v12 = vmul.f32 -1.442695, %v518_v2  ;;  %v592_v13 = vadd.f32 %v1002_v54, %v591_v3  ;;  %vm714_vm8 = vweird.f32 %v1004_v5 }
 0x127   : > { %v1008_v14 = vpop.eup %1007  ;;  %v1307_v15 = vadd.f32 1.0, %v1006_v10  ;;  %vm715_vm11 = vmor %vm713_vm5, %vm714_vm8 }
 0x128   : > { %v1010_v21 = vpop.eup %1009  ;;  %v710_v18 = vsub.f32 1.0, %v709_v11  ;;  %v604_v22 = vmul.f32 %v1008_v14, %v1280_v55  ;;  %1011 = vpow2.f32 %v970_v12  ;;  %v596_v19 = vsel %vm595_vm6, %v1002_v54, %v592_v13 }
 0x129   : > { %1013 = vrcp.f32 %v1307_v15  ;;  %v1325_v23 = vadd.f32 1.0, %v1010_v21  ;;  %v601_v26 = vsel %vm1295_vm4, %v600_v7, %v596_v19  ;;  %v497_v27 = vpop.xlane.xlu2 %496  ;;  %vm609_vm10 = vweird.f32 %v1008_v14 }
 0x12a   : > { %v605_v29 = vsub.f32 1.0, %v604_v22  ;;  %v831_v31 = vsel %vm830_vm1, %v601_v26, %v391_v61  ;;  %v519_v32 = vadd.f32 %v1267_v30, %v497_v27  ;;  %v711_v33 = vmul.f32 %v1004_v5, %v710_v18  ;;  %vm610_vm13 = vmor %vm608_vm9, %vm609_vm10 }
 0x12b   : > { %1015 = vrcp.f32 %v1325_v23  ;;  %847 = vst [vmem:[%s1321_s24] sm:$0xff] %v831_v31  ;;  %v481_v34 = vpop.xlane.xlu1 %480  ;;  %v732_v40 = vand.u32 2147483647, %v1325_v23  ;;  %v734_v41 = vand.u32 2147483648, %v1325_v23  ;;  %vm728_vm14 = vweird.f32 %v1325_v23 }
 0x12c   : > { %v971_v36 = vmul.f32 -1.442695, %v519_v32  ;;  %v511_v37 = vadd.f32 %v1267_v30, %v481_v34  ;;  %v712_v25 = vadd.f32 %v1004_v5, %v711_v33  ;;  %v606_v38 = vmul.f32 %v1008_v14, %v605_v29 }
 0x12d   : > { %v735_v61 = vor.u32 1.1754944e-38, %v734_v41  ;;  %v627_v62 = vand.u32 2147483647, %v1307_v15  ;;  %vm1371_vm15 = vcmp.eq.f32.partialorder %v732_v40, 8.507059e+37  ;;  %vm623_vm0 = vweird.f32 %v1307_v15 }
 0x12e   : > { %v1012_v42 = vpop.eup %1011  ;;  %1017 = vpow2.f32 %v971_v36  ;;  %v963_v43 = vmul.f32 -1.442695, %v511_v37  ;;  %v716_v44 = vsel %vm715_vm11, %v1004_v5, %v712_v25  ;;  %v607_v45 = vadd.f32 %v1008_v14, %v606_v38 }
 0x12f   : > { %v1014_v47 = vpop.eup %1013  ;;  %v1346_v48 = vadd.f32 1.0, %v1012_v42  ;;  %v721_v49 = vsel %vm1310_vm7, %v720_v39, %v716_v44  ;;  %v629_v5 = vand.u32 2147483648, %v1307_v15  ;;  %vm1382_vm3 = vcmp.eq.f32.partialorder %v627_v62, 8.507059e+37  ;;  %v423_v39 = vpop.f32.mrf.mxu3 }
 0x130   : > { %v619_v52 = vmul.f32 %v1014_v47, %v1307_v15  ;;  %1019 = vpow2.f32 %v963_v43  ;;  %v839_v54 = vsel %vm830_vm1, %v721_v49, %v1288_v63  ;;  %v611_v57 = vsel %vm610_vm13, %v1008_v14, %v607_v45 }
 0x131   : > { %v1016_v58 = vpop.eup %1015  ;;  %1021 = vrcp.f32 %v1346_v48  ;;  %855 = vst [vmem:[%s1321_s24 + $0x40] sm:$0xff] %v839_v54  ;;  %v616_v55 = vsel %vm1340_vm12, %v615_v50, %v611_v57  ;;  %v483_v59 = vpop.xlane.xlu2 %482  ;;  %vm624_vm2 = vweird.f32 %v1014_v47  ;;  %v749_v17 = vand.u32 2147483648, %v1346_v48 }
 0x132   : > { %v499_v60 = vpop.xlane.xlu0 %498  ;;  %v620_v24 = vsub.f32 1.0, %v619_v52  ;;  %v724_v0 = vmul.f32 %v1016_v58, %v1325_v23  ;;  %v832_v63 = vsel %vm830_vm1, %v616_v55, %v1292_v1  ;;  %v512_v2 = vadd.f32 %v1267_v30, %v483_v59  ;;  %vm625_vm5 = vmor %vm623_vm0, %vm624_vm2  ;;  %v402_v52 = vpop.f32.mrf.mxu1 }
 0x133   : > { %848 = vst [vmem:[%s1321_s24 + $0x8] sm:$0xff] %v832_v63  ;;  %v520_v4 = vadd.f32 %v1267_v30, %v499_v60  ;;  %v747_v1 = vand.u32 2147483647, %v1346_v48  ;;  %vm729_vm4 = vweird.f32 %v1016_v58  ;;  %v630_v26 = vor.u32 1.1754944e-38, %v629_v5 }
 0x134   : > { %v1018_v7 = vpop.eup %1017  ;;  %v725_v10 = vsub.f32 1.0, %v724_v0  ;;  %v964_v11 = vmul.f32 -1.442695, %v512_v2  ;;  %v621_v12 = vmul.f32 %v1014_v47, %v620_v24  ;;  %vm743_vm6 = vweird.f32 %v1346_v48  ;;  %vm730_vm8 = vmor %vm728_vm14, %vm729_vm4 }
 0x135   : > { %v1380_v13 = vadd.f32 1.0, %v1018_v7  ;;  %v972_v14 = vmul.f32 -1.442695, %v520_v4  ;;  %vm1395_vm7 = vcmp.eq.f32.partialorder %v747_v1, 8.507059e+37  ;;  %v750_v34 = vor.u32 1.1754944e-38, %v749_v17 }
 0x136   : > { %v1020_v20 = vpop.eup %1019  ;;  %1023 = vpow2.f32 %v964_v11  ;;  %v726_v21 = vmul.f32 %v1016_v58, %v725_v10  ;;  %v622_v18 = vadd.f32 %v1014_v47, %v621_v12  ;;  %v1426_v49 = vadd.f32 %v423_v39, %v1277_v53 }
 0x137   : > { %v1022_v22 = vpop.eup %1021  ;;  %1025 = vrcp.f32 %v1380_v13  ;;  %v1388_v19 = vadd.f32 1.0, %v1020_v20  ;;  %vm758_vm10 = vweird.f32 %v1380_v13  ;;  %v762_v50 = vand.u32 2147483647, %v1380_v13  ;;  %v426_v20 = vpop.f32.mrf.mxu3 }
 0x138   : > { %v739_v27 = vmul.f32 %v1022_v22, %v1346_v48  ;;  %1027 = vpow2.f32 %v972_v14  ;;  %v727_v29 = vadd.f32 %v1016_v58, %v726_v21  ;;  %v626_v31 = vsel %vm625_vm5, %v1014_v47, %v622_v18 }
 0x139   : > { %1029 = vrcp.f32 %v1388_v19  ;;  %v631_v15 = vsel %vm1382_vm3, %v630_v26, %v626_v31  ;;  %v485_v33 = vpop.xlane.xlu2 %484  ;;  %vm744_vm9 = vweird.f32 %v1022_v22  ;;  %v642_v40 = vand.u32 2147483647, %v1388_v19 }
 0x13a   : > { %v740_v36 = vsub.f32 1.0, %v739_v27  ;;  %v731_v37 = vsel %vm730_vm8, %v1016_v58, %v727_v29  ;;  %v833_v25 = vsel %vm830_vm1, %v631_v15, %v1303_v9  ;;  %v513_v38 = vadd.f32 %v1267_v30, %v485_v33  ;;  %vm745_vm11 = vmor %vm743_vm6, %vm744_vm9 }
 0x13b   : > { %v736_v23 = vsel %vm1371_vm15, %v735_v61, %v731_v37  ;;  %849 = vst [vmem:[%s1321_s24 + $0x10] sm:$0xff] %v833_v25  ;;  %v487_v28 = vpop.xlane.xlu0 %486  ;;  %v644_v41 = vand.u32 2147483648, %v1388_v19  ;;  %vm638_vm12 = vweird.f32 %v1388_v19  ;;  %vm1440_vm13 = vcmp.eq.f32.partialorder %v642_v40, 8.507059e+37  ;;  %v405_v25 = vpop.f32.mrf.mxu1 }
 0x13c   : > { %v1024_v42 = vpop.eup %1023  ;;  %v840_v43 = vsel %vm830_vm1, %v736_v23, %v1300_v8  ;;  %v965_v9 = vmul.f32 -1.442695, %v513_v38  ;;  %v514_v44 = vadd.f32 %v1267_v30, %v487_v28  ;;  %v741_v45 = vmul.f32 %v1022_v22, %v740_v36 }
 0x13d   : > { %v1420_v46 = vpop.eup %1025  ;;  %v1422_v47 = vadd.f32 1.0, %v1024_v42  ;;  %856 = vst [vmem:[%s1321_s24 + $0x48] sm:$0xff] %v840_v43  ;;  %v645_v60 = vor.u32 1.1754944e-38, %v644_v41  ;;  %vm1447_vm14 = vcmp.eq.f32.partialorder %v762_v50, 8.507059e+37  ;;  %v764_v3 = vand.u32 2147483648, %v1380_v13 }
 0x13e   : > { %v1028_v54 = vpop.eup %1027  ;;  %v754_v8 = vmul.f32 %v1420_v46, %v1380_v13  ;;  %1031 = vpow2.f32 %v965_v9  ;;  %v966_v57 = vmul.f32 -1.442695, %v514_v44  ;;  %v742_v58 = vadd.f32 %v1022_v22, %v741_v45 }
 0x13f   : > { %v1030_v55 = vpop.eup %1029  ;;  %1033 = vrcp.f32 %v1422_v47  ;;  %v1433_v59 = vadd.f32 1.0, %v1028_v54  ;;  %vm759_vm0 = vweird.f32 %v1420_v46  ;;  %v657_v11 = vand.u32 2147483647, %v1422_v47 }
 0x140   : > { %v755_v61 = vsub.f32 1.0, %v754_v8  ;;  %v634_v62 = vmul.f32 %v1030_v55, %v1388_v19  ;;  %1035 = vpow2.f32 %v966_v57  ;;  %v746_v24 = vsel %vm745_vm11, %v1022_v22, %v742_v58  ;;  %vm1472_vm3 = vmor %vm758_vm10, %vm759_vm0 }
 0x141   : > { %1037 = vrcp.f32 %v1433_v59  ;;  %v751_v63 = vsel %vm1395_vm7, %v750_v34, %v746_v24  ;;  %v503_v48 = vpop.xlane.xlu2 %502  ;;  %vm639_vm15 = vweird.f32 %v1030_v55  ;;  %v659_v12 = vand.u32 2147483648, %v1422_v47 }
 0x142   : > { %v635_v4 = vsub.f32 1.0, %v634_v62  ;;  %v841_v5 = vsel %vm830_vm1, %v751_v63, %v1354_v51  ;;  %v522_v6 = vadd.f32 %v1267_v30, %v503_v48  ;;  %v756_v7 = vmul.f32 %v1420_v46, %v755_v61  ;;  %vm640_vm5 = vmor %vm638_vm12, %vm639_vm15  ;;  %v1525_v63 = vpop.f32.mrf.mxu3 }
 0x143   : > { %857 = vst [vmem:[%s1321_s24 + $0x50] sm:$0xff] %v841_v5  ;;  %v489_v10 = vpop.xlane.xlu1 %488  ;;  %v765_v22 = vor.u32 1.1754944e-38, %v764_v3  ;;  %v403_v26 = vadd.f32 %v402_v52, %v1277_v53  ;;  %vm653_vm2 = vweird.f32 %v1422_v47  ;;  %vm1476_vm4 = vcmp.eq.f32.partialorder %v657_v11, 8.507059e+37  ;;  %v408_v11 = vpop.f32.mrf.mxu1 }
 0x144   : > { %v1032_v1 = vpop.eup %1031  ;;  %v636_v14 = vmul.f32 %v1030_v55, %v635_v4  ;;  %v974_v16 = vmul.f32 -1.442695, %v522_v6  ;;  %v515_v17 = vadd.f32 %v1267_v30, %v489_v10  ;;  %v757_v51 = vadd.f32 %v1420_v46, %v756_v7 }
 0x145   : > { %v1034_v21 = vpop.eup %1033  ;;  %v1463_v18 = vadd.f32 1.0, %v1032_v1  ;;  %v660_v37 = vor.u32 1.1754944e-38, %v659_v12  ;;  %v777_v50 = vand.u32 2147483647, %v1433_v59  ;;  %v779_v52 = vand.u32 2147483648, %v1433_v59 }
 0x146   : > { %v1036_v27 = vpop.eup %1035  ;;  %v649_v29 = vmul.f32 %v1034_v21, %v1422_v47  ;;  %v637_v31 = vadd.f32 %v1030_v55, %v636_v14  ;;  %1039 = vpow2.f32 %v974_v16  ;;  %v967_v32 = vmul.f32 -1.442695, %v515_v17 }
 0x147   : > { %v1480_v34 = vpop.eup %1037  ;;  %1041 = vrcp.f32 %v1463_v18  ;;  %v1483_v36 = vadd.f32 1.0, %v1036_v27  ;;  %v761_v13 = vsel %vm1472_vm3, %v1420_v46, %v757_v51  ;;  %vm654_vm6 = vweird.f32 %v1034_v21 }
 0x148   : > { %v650_v38 = vsub.f32 1.0, %v649_v29  ;;  %v769_v39 = vmul.f32 %v1480_v34, %v1433_v59  ;;  %v641_v23 = vsel %vm640_vm5, %v1030_v55, %v637_v31  ;;  %1043 = vpow2.f32 %v967_v32  ;;  %vm655_vm8 = vmor %vm653_vm2, %vm654_vm6 }
 0x149   : > { %1045 = vrcp.f32 %v1483_v36  ;;  %v646_v19 = vsel %vm1440_vm13, %v645_v60, %v641_v23  ;;  %v766_v28 = vsel %vm1447_vm14, %v765_v22, %v761_v13  ;;  %v505_v40 = vpop.xlane.xlu0 %504  ;;  %v427_v46 = vadd.f32 %v426_v20, %v1277_v53 }
 0x14a   : > { %v770_v41 = vsub.f32 1.0, %v769_v39  ;;  %v834_v42 = vsel %vm830_vm1, %v646_v19, %v1405_v35  ;;  %v842_v43 = vsel %vm830_vm1, %v766_v28, %v1426_v49  ;;  %v651_v9 = vmul.f32 %v1034_v21, %v650_v38 }
 0x14b   : > { %850 = vst [vmem:[%s1321_s24 + $0x18] sm:$0xff] %v834_v42  ;;  %v523_v44 = vadd.f32 %v1267_v30, %v505_v40  ;;  %v501_v45 = vpop.xlane.xlu1 %500  ;;  %vm773_vm7 = vweird.f32 %v1433_v59  ;;  %vm774_vm9 = vweird.f32 %v1480_v34  ;;  %vm1519_vm10 = vcmp.eq.f32.partialorder %v777_v50, 8.507059e+37  ;;  %v432_v40 = vpop.f32.mrf.mxu3 }
 0x14c   : > { %v1040_v54 = vpop.eup %1039  ;;  %858 = vst [vmem:[%s1321_s24 + $0x58] sm:$0xff] %v842_v43  ;;  %v652_v8 = vadd.f32 %v1034_v21, %v651_v9  ;;  %v521_v35 = vadd.f32 %v1267_v30, %v501_v45  ;;  %v771_v57 = vmul.f32 %v1480_v34, %v770_v41  ;;  %v780_v3 = vor.u32 1.1754944e-38, %v779_v52  ;;  %vm775_vm11 = vmor %vm773_vm7, %vm774_vm9  ;;  %v411_v52 = vpop.f32.mrf.mxu1 }
 0x14d   : > { %v1042_v49 = vpop.eup %1041  ;;  %v1513_v58 = vadd.f32 1.0, %v1040_v54  ;;  %v975_v55 = vmul.f32 -1.442695, %v523_v44  ;;  %v672_v10 = vand.u32 2147483647, %v1463_v18  ;;  %v406_v16 = vadd.f32 %v405_v25, %v1277_v53 }
 0x14e   : > { %v1044_v61 = vpop.eup %1043  ;;  %v664_v30 = vmul.f32 %v1042_v49, %v1463_v18  ;;  %v656_v62 = vsel %vm655_vm8, %v1034_v21, %v652_v8  ;;  %v973_v24 = vmul.f32 -1.442695, %v521_v35  ;;  %v772_v0 = vadd.f32 %v1480_v34, %v771_v57 }
 0x14f   : > { %v1046_v48 = vpop.eup %1045  ;;  %1047 = vrcp.f32 %v1513_v58  ;;  %v1528_v47 = vadd.f32 1.0, %v1044_v61  ;;  %v661_v2 = vsel %vm1476_vm4, %v660_v37, %v656_v62  ;;  %vm669_vm12 = vweird.f32 %v1042_v49 }
 0x150   : > { %v665_v4 = vsub.f32 1.0, %v664_v30  ;;  %v679_v5 = vmul.f32 %v1046_v48, %v1483_v36  ;;  %v835_v6 = vsel %vm830_vm1, %v661_v2, %v403_v26  ;;  %1049 = vpow2.f32 %v975_v55 }
 0x151   : > { %1051 = vrcp.f32 %v1528_v47  ;;  %851 = vst [vmem:[%s1321_s24 + $0x20] sm:$0xff] %v835_v6  ;;  %v776_v7 = vsel %vm775_vm11, %v1480_v34, %v772_v0  ;;  %vm668_vm13 = vweird.f32 %v1463_v18  ;;  %v674_v17 = vand.u32 2147483648, %v1463_v18 }
 0x152   : > { %v680_v12 = vsub.f32 1.0, %v679_v5  ;;  %1053 = vpow2.f32 %v973_v24  ;;  %v781_v1 = vsel %vm1519_vm10, %v780_v3, %v776_v7  ;;  %v666_v14 = vmul.f32 %v1042_v49, %v665_v4  ;;  %vm670_vm15 = vmor %vm668_vm13, %vm669_vm12 }
 0x153   : > { %v843_v59 = vsel %vm830_vm1, %v781_v1, %v427_v46  ;;  %vm1551_vm14 = vcmp.eq.f32.partialorder %v672_v10, 8.507059e+37  ;;  %v409_v21 = vadd.f32 %v408_v11, %v1277_v53  ;;  %v675_v27 = vor.u32 1.1754944e-38, %v674_v17  ;;  %v435_v4 = vpop.f32.mrf.mxu3 }
 0x154   : > { %859 = vst [vmem:[%s1321_s24 + $0x60] sm:$0xff] %v843_v59  ;;  %v667_v51 = vadd.f32 %v1042_v49, %v666_v14  ;;  %v681_v22 = vmul.f32 %v1046_v48, %v680_v12  ;;  %vm684_vm0 = vweird.f32 %v1046_v48  ;;  %v687_v29 = vand.u32 2147483647, %v1483_v36 }
 0x155   : > { %v1048_v26 = vpop.eup %1047  ;;  %v689_v31 = vand.u32 2147483648, %v1483_v36  ;;  %vm683_vm2 = vweird.f32 %v1483_v36  ;;  %vm803_vm6 = vweird.f32 %v1513_v58  ;;  %v807_v45 = vand.u32 2147483647, %v1513_v58 }
 0x156   : > { %v1050_v32 = vpop.eup %1049  ;;  %v799_v18 = vmul.f32 %v1048_v26, %v1513_v58  ;;  %v671_v15 = vsel %vm670_vm15, %v1042_v49, %v667_v51  ;;  %v682_v33 = vadd.f32 %v1046_v48, %v681_v22  ;;  %vm685_vm3 = vmor %vm683_vm2, %vm684_vm0  ;;  %vm688_vm4 = vcmp.eq.f32.partialorder %v687_v29, 8.507059e+37 }
 0x157   : > { %v1052_v34 = vpop.eup %1051  ;;  %v1561_v13 = vadd.f32 1.0, %v1050_v32  ;;  %v676_v37 = vsel %vm1551_vm14, %v675_v27, %v671_v15  ;;  %v690_v25 = vor.u32 1.1754944e-38, %v689_v31  ;;  %vm804_vm5 = vweird.f32 %v1048_v26 }
 0x158   : > { %v1054_v38 = vpop.eup %1053  ;;  %v800_v39 = vsub.f32 1.0, %v799_v18  ;;  %v694_v23 = vmul.f32 %v1052_v34, %v1528_v47  ;;  %v836_v19 = vsel %vm830_vm1, %v676_v37, %v406_v16  ;;  %v686_v28 = vsel %vm685_vm3, %v1046_v48, %v682_v33  ;;  %vm805_vm7 = vmor %vm803_vm6, %vm804_vm5 }
 0x159   : > { %1055 = vrcp.f32 %v1561_v13  ;;  %v1569_v36 = vadd.f32 1.0, %v1054_v38  ;;  %852 = vst [vmem:[%s1321_s24 + $0x28] sm:$0xff] %v836_v19  ;;  %v691_v41 = vsel %vm688_vm4, %v690_v25, %v686_v28  ;;  %v809_v46 = vand.u32 2147483648, %v1513_v58 }
 0x15a   : > { %v695_v42 = vsub.f32 1.0, %v694_v23  ;;  %v837_v43 = vsel %vm830_vm1, %v691_v41, %v409_v21  ;;  %v801_v9 = vmul.f32 %v1048_v26, %v800_v39  ;;  %v433_v50 = vadd.f32 %v432_v40, %v1277_v53 }
 0x15b   : > { %1057 = vrcp.f32 %v1569_v36  ;;  %853 = vst [vmem:[%s1321_s24 + $0x30] sm:$0xff] %v837_v43  ;;  %v810_v35 = vor.u32 1.1754944e-38, %v809_v46  ;;  %vm698_vm8 = vweird.f32 %v1528_v47  ;;  %vm699_vm9 = vweird.f32 %v1052_v34 }
 0x15c   : > { %v802_v44 = vadd.f32 %v1048_v26, %v801_v9  ;;  %v696_v54 = vmul.f32 %v1052_v34, %v695_v42  ;;  %vm808_vm10 = vcmp.eq.f32.partialorder %v807_v45, 8.507059e+37  ;;  %v702_v55 = vand.u32 2147483647, %v1528_v47  ;;  %vm700_vm11 = vmor %vm698_vm8, %vm699_vm9 }
 0x15d   : > { %v704_v60 = vand.u32 2147483648, %v1528_v47  ;;  %v412_v30 = vadd.f32 %v411_v52, %v1277_v53  ;;  %v824_v5 = vand.u32 2147483648, %v1561_v13  ;;  %v822_v11 = vand.u32 2147483647, %v1561_v13 }
 0x15e   : > { %v806_v8 = vsel %vm805_vm7, %v1048_v26, %v802_v44  ;;  %v697_v49 = vadd.f32 %v1052_v34, %v696_v54  ;;  %vm703_vm12 = vcmp.eq.f32.partialorder %v702_v55, 8.507059e+37  ;;  %v792_v12 = vand.u32 2147483647, %v1569_v36 }
 0x15f   : > { %v1056_v57 = vpop.eup %1055  ;;  %v811_v61 = vsel %vm808_vm10, %v810_v35, %v806_v8  ;;  %v705_v48 = vor.u32 1.1754944e-38, %v704_v60  ;;  %v794_v1 = vand.u32 2147483648, %v1569_v36  ;;  %v436_v14 = vadd.f32 %v435_v4, %v1277_v53 }
 0x160   : > { %v814_v58 = vmul.f32 %v1056_v57, %v1561_v13  ;;  %v845_v24 = vsel %vm830_vm1, %v811_v61, %v433_v50  ;;  %v701_v0 = vsel %vm700_vm11, %v1052_v34, %v697_v49  ;;  %vm819_vm13 = vweird.f32 %v1056_v57 }
 0x161   : > { %v1058_v62 = vpop.eup %1057  ;;  %861 = vst [vmem:[%s1321_s24 + $0x70] sm:$0xff] %v845_v24  ;;  %v706_v47 = vsel %vm703_vm12, %v705_v48, %v701_v0  ;;  %vm818_vm15 = vweird.f32 %v1561_v13  ;;  %v825_v17 = vor.u32 1.1754944e-38, %v824_v5  ;;  %vm788_vm2 = vweird.f32 %v1569_v36 }
 0x162   : > { %v815_v2 = vsub.f32 1.0, %v814_v58  ;;  %v784_v3 = vmul.f32 %v1058_v62, %v1569_v36  ;;  %v838_v7 = vsel %vm830_vm1, %v706_v47, %v412_v30  ;;  %vm789_vm14 = vweird.f32 %v1058_v62  ;;  %vm820_vm0 = vmor %vm818_vm15, %vm819_vm13 }
 0x163   : > { %854 = vst [vmem:[%s1321_s24 + $0x38] sm:$0xff] %v838_v7  ;;  %vm823_vm3 = vcmp.eq.f32.partialorder %v822_v11, 8.507059e+37  ;;  %vm790_vm4 = vmor %vm788_vm2, %vm789_vm14  ;;  %v795_v21 = vor.u32 1.1754944e-38, %v794_v1  ;;  %v430_v26 = vadd.f32 %v1525_v63, %v1277_v53  ;;  %vm793_vm5 = vcmp.eq.f32.partialorder %v792_v12, 8.507059e+37 }
 0x164   : > { %v785_v6 = vsub.f32 1.0, %v784_v3  ;;  %v816_v10 = vmul.f32 %v1056_v57, %v815_v2 }
 0x166   : > { %v786_v59 = vmul.f32 %v1058_v62, %v785_v6  ;;  %v817_v16 = vadd.f32 %v1056_v57, %v816_v10 }
 0x168   : > { %v787_v51 = vadd.f32 %v1058_v62, %v786_v59  ;;  %v821_v20 = vsel %vm820_vm0, %v1056_v57, %v817_v16 }
 0x169   : > { %v826_v22 = vsel %vm823_vm3, %v825_v17, %v821_v20 }
 0x16a   : > { %v791_v27 = vsel %vm790_vm4, %v1058_v62, %v787_v51  ;;  %v846_v29 = vsel %vm830_vm1, %v826_v22, %v436_v14 }
 0x16b   : > { %v796_v31 = vsel %vm793_vm5, %v795_v21, %v791_v27  ;;  %862 = vst [vmem:[%s1321_s24 + $0x78] sm:$0xff] %v846_v29 }
 0x16c   : > { %v844_v32 = vsel %vm830_vm1, %v796_v31, %v430_v26 }
 0x16d   : > { %860 = vst [vmem:[%s1321_s24 + $0x68] sm:$0xff] %v844_v32 }
 0x16e PF: > { %s16_s20 = sadd.s32 1, %s1065_s20  }
 0x16f   : > { %p13_p4 = scmp.ge.s32.totalorder %s16_s20, 4  }
 0x171   :  { %15 = sbr.rel (!%p13_p4) target bundleno = 2 (0x2), region = 70 }

</bundles_post_ra>
